<compile_context>
chip_gen: v6e
topology: v6e:2x2x1
jax: 0.10.0
libtpu: 0.0.40
codegen_flags: <defaults>
</compile_context>

<pallas_src>
import jax
import jax.numpy as jnp
from jax.experimental import pallas as pl
from jax.experimental.pallas import tpu as pltpu


_VMEM_LIMIT_BYTES = 32 * 1024 * 1024


def _round_up(n, m):
    return ((n + m - 1) // m) * m


def _scores_kernel(x_ref, wqk_ref, bqk_ref, s_ref):
    """Per-row score s[b] = dot(Q[b], K[b]) for one batch tile."""
    x = x_ref[...]
    if x.dtype != wqk_ref.dtype:
        x = x.astype(wqk_ref.dtype)          # bf16 MXU inputs when requested
    qk = jnp.dot(x, wqk_ref[...],
                 preferred_element_type=jnp.float32) + bqk_ref[...]
    e_col = wqk_ref.shape[1] // 2             # 128-lane-aligned group stride
    q = qk[:, :e_col]                          # tile-aligned slices (free)
    k = qk[:, e_col:]
    # Padded lanes of q and k are exactly 0 (zero weight cols + zero bias),
    # so the lane reduction equals the true E-dim dot product.
    s_ref[...] = jnp.sum(q * k, axis=1, keepdims=True)


def _output_kernel(w_ref, x_ref, wv_ref, bv_ref, o_ref):
    """output[b] = weights[b] * V[b] for one batch tile (V projection only)."""
    x = x_ref[...]
    if x.dtype != wv_ref.dtype:
        x = x.astype(wv_ref.dtype)
    v = jnp.dot(x, wv_ref[...],
                preferred_element_type=jnp.float32) + bv_ref[...]
    o_ref[...] = (w_ref[...] * v).astype(o_ref.dtype)


def prepare_params(wq, bq, wk, bk, wv, bv, compute_dtype=jnp.float32):
    """One-time packing of the three nn.Linear layers.

    Returns (w_qk, b_qk, w_v, b_v):
      w_qk: (E, 2*e_col) packed [Wq^T | Wk^T] with each group starting at a
            128-lane offset (e_col = round_up(E, 128)); zero-padded columns.
      b_qk: (1, 2*e_col) f32 packed [bq | bk], zero-padded.
      w_v:  (E, E) Wv^T.
      b_v:  (1, E) f32.
    Matmul inputs (w_qk, w_v) are cast to compute_dtype (f32, or bf16 — valid
    on all generations incl. v5e); biases and all softmax math stay f32.
    """
    e = wq.shape[0]
    e_col = _round_up(max(e, 128), 128)
    w_qk = jnp.zeros((e, 2 * e_col), jnp.float32)
    b_qk = jnp.zeros((1, 2 * e_col), jnp.float32)
    w_qk = w_qk.at[:, :e].set(wq.T.astype(jnp.float32))
    w_qk = w_qk.at[:, e_col:e_col + e].set(wk.T.astype(jnp.float32))
    b_qk = b_qk.at[0, :e].set(bq.astype(jnp.float32))
    b_qk = b_qk.at[0, e_col:e_col + e].set(bk.astype(jnp.float32))
    w_v = wv.T.astype(jnp.float32)
    b_v = bv.astype(jnp.float32).reshape(1, e)
    return (w_qk.astype(compute_dtype), b_qk,
            w_v.astype(compute_dtype), b_v)


def attention_layer(x, params, *, tile_b=2048, out_dtype=None):
    """x: (B, E).  params = prepare_params(...) (done once, reused per call)."""
    w_qk, b_qk, w_v, b_v = params
    batch, e = x.shape
    out_dtype = x.dtype if out_dtype is None else out_dtype

    # Sublane-aligned batch tile; no host-side padding of x — the trailing
    # grid tile is ragged (OOB rows are read as garbage but never written back
    # and never enter the softmax, which only sees the (B,1) score output).
    tb = min(_round_up(tile_b, 8), _round_up(batch, 8))
    nb = pl.cdiv(batch, tb)

    compiler_params = pltpu.CompilerParams(
        dimension_semantics=("parallel",),       # megacore sharding on v7x
        vmem_limit_bytes=_VMEM_LIMIT_BYTES,
    )

    # ---- Pass 1: per-row scores (fused Q|K projection, one MXU matmul) ----
    scores = pl.pallas_call(
        _scores_kernel,
        out_shape=jax.ShapeDtypeStruct((batch, 1), jnp.float32),
        grid_spec=pltpu.PrefetchScalarGridSpec(
            num_scalar_prefetch=0,
            grid=(nb,),
            in_specs=[
                pl.BlockSpec((tb, e), lambda i: (i, 0)),         # x tile
                pl.BlockSpec(w_qk.shape, lambda i: (0, 0)),      # resident W_qk
                pl.BlockSpec(b_qk.shape, lambda i: (0, 0)),      # resident bias
            ],
            out_specs=pl.BlockSpec((tb, 1), lambda i: (i, 0)),
        ),
        compiler_params=compiler_params,
    )(x, w_qk, b_qk)

    # ---- Tiny epilogue: global softmax over the batch axis (O(B) scalars) ----
    weights = jax.nn.softmax(scores, axis=0)                     # (B, 1) f32

    # ---- Pass 2: V projection only + scale by the batch-softmax weights ----
    out = pl.pallas_call(
        _output_kernel,
        out_shape=jax.ShapeDtypeStruct((batch, e), out_dtype),
        grid_spec=pltpu.PrefetchScalarGridSpec(
            num_scalar_prefetch=0,
            grid=(nb,),
            in_specs=[
                pl.BlockSpec((tb, 1), lambda i: (i, 0)),         # weights tile
                pl.BlockSpec((tb, e), lambda i: (i, 0)),         # x tile
                pl.BlockSpec(w_v.shape, lambda i: (0, 0)),       # resident W_v
                pl.BlockSpec(b_v.shape, lambda i: (0, 0)),       # resident bias
            ],
            out_specs=pl.BlockSpec((tb, e), lambda i: (i, 0)),
        ),
        compiler_params=compiler_params,
    )(weights, x, w_v, b_v)

    return out


def attention_layer_ref(x, wq, bq, wk, bk, wv, bv):
    """Pure-JAX reference mirroring the PyTorch forward."""
    q = x @ wq.T + bq
    k = x @ wk.T + bk
    v = x @ wv.T + bv
    scores = jnp.sum(q * k, axis=-1)              # (B,)
    w = jax.nn.softmax(scores, axis=-1)           # softmax over batch
    return w[:, None] * v


if __name__ == "__main__":
    E = 32
    key = jax.random.PRNGKey(0)
    kx, kq, kbq, kk, kbk, kv, kbv, kx2 = jax.random.split(key, 8)

    # PyTorch nn.Linear default init: U(-1/sqrt(E), 1/sqrt(E)).
    bound = 1.0 / (E ** 0.5)
    wq = jax.random.uniform(kq, (E, E), jnp.float32, -bound, bound)
    bq = jax.random.uniform(kbq, (E,), jnp.float32, -bound, bound)
    wk = jax.random.uniform(kk, (E, E), jnp.float32, -bound, bound)
    bk = jax.random.uniform(kbk, (E,), jnp.float32, -bound, bound)
    wv = jax.random.uniform(kv, (E, E), jnp.float32, -bound, bound)
    bv = jax.random.uniform(kbv, (E,), jnp.float32, -bound, bound)

    # --- f32 path, single tile (B=8) --------------------------------------
    x = jax.random.normal(kx, (8, E), jnp.float32)
    params_f32 = prepare_params(wq, bq, wk, bk, wv, bv, jnp.float32)
    out = jax.block_until_ready(attention_layer(x, params_f32))
    ref = attention_layer_ref(x, wq, bq, wk, bk, wv, bv)
    assert out.shape == (8, E)
    assert jnp.allclose(out, ref, atol=1e-5, rtol=1e-5), "f32 single-tile mismatch"

    # --- f32 path, multi-tile with a ragged trailing tile (B=37, tile_b=16) -
    x2 = jax.random.normal(kx2, (37, E), jnp.float32)
    out2 = jax.block_until_ready(attention_layer(x2, params_f32, tile_b=16))
    ref2 = attention_layer_ref(x2, wq, bq, wk, bk, wv, bv)
    assert out2.shape == (37, E)
    assert jnp.allclose(out2, ref2, atol=1e-5, rtol=1e-5), "f32 ragged multi-tile mismatch"

    # --- bf16 matmul weights / f32 accumulation (valid on v5e/v6e/v7x) -----
    params_bf16 = prepare_params(wq, bq, wk, bk, wv, bv, jnp.bfloat16)
    out3 = jax.block_until_ready(attention_layer(x, params_bf16))
    assert jnp.allclose(out3, ref, atol=1e-1, rtol=1e-1), "bf16 path mismatch"

    print("KERNEL_OK")
</pallas_src>

<mosaic_0001>
module attributes {stable_mosaic.version = 11 : i64} {
  func.func @_scores_kernel(%arg0: i32, %arg1: memref<8x32xf32, #tpu.memory_space<vmem>>, %arg2: memref<32x256xf32, #tpu.memory_space<vmem>>, %arg3: memref<1x256xf32, #tpu.memory_space<vmem>>, %arg4: memref<8x1xf32, #tpu.memory_space<vmem>>) attributes {dimension_semantics = [#tpu.dimension_semantics<parallel>], iteration_bounds = array<i64: 1>, scalar_prefetch = 0 : i64, scratch_operands = 0 : i64, tpu.core_type = #tpu.core_type<tc>, window_params = [{transform_indices = @transform_0, window_bounds = array<i64: 8, 32>}, {pipeline_mode = #tpu.pipeline_mode<synchronous>, transform_indices = @transform_1, window_bounds = array<i64: 32, 256>}, {pipeline_mode = #tpu.pipeline_mode<synchronous>, transform_indices = @transform_2, window_bounds = array<i64: 1, 256>}, {transform_indices = @transform_3, window_bounds = array<i64: 8, 1>}]} {
    %c0 = arith.constant 0 : index
    %c0_0 = arith.constant 0 : index
    %0 = vector.load %arg1[%c0, %c0_0] : memref<8x32xf32, #tpu.memory_space<vmem>>, vector<8x32xf32>
    %c0_1 = arith.constant 0 : index
    %c0_2 = arith.constant 0 : index
    %1 = vector.load %arg2[%c0_1, %c0_2] : memref<32x256xf32, #tpu.memory_space<vmem>>, vector<32x256xf32>
    %cst = arith.constant dense<0.000000e+00> : vector<8x256xf32>
    %2 = tpu.matmul %0, %1, %cst {dimension_numbers = #tpu.dot_dimension_numbers<[1], [0], [0], [1], [0, 0, 1, 1], [], []>} : vector<8x32xf32>, vector<32x256xf32>, vector<8x256xf32> -> vector<8x256xf32>
    %c0_3 = arith.constant 0 : index
    %c0_4 = arith.constant 0 : index
    %3 = vector.load %arg3[%c0_3, %c0_4] : memref<1x256xf32, #tpu.memory_space<vmem>>, vector<1x256xf32>
    %4 = vector.broadcast %3 : vector<1x256xf32> to vector<8x256xf32>
    %5 = arith.addf %2, %4 : vector<8x256xf32>
    %6 = vector.extract_strided_slice %5 {offsets = [0, 0], sizes = [8, 128], strides = [1, 1]} : vector<8x256xf32> to vector<8x128xf32>
    %7 = vector.extract_strided_slice %5 {offsets = [0, 128], sizes = [8, 128], strides = [1, 1]} : vector<8x256xf32> to vector<8x128xf32>
    %8 = arith.mulf %6, %7 : vector<8x128xf32>
    %cst_5 = arith.constant dense<0.000000e+00> : vector<8xf32>
    %9 = vector.multi_reduction <add>, %8, %cst_5 [1] : vector<8x128xf32> to vector<8xf32>
    %10 = vector.shape_cast %9 : vector<8xf32> to vector<8x1xf32>
    %c0_6 = arith.constant 0 : index
    %c0_7 = arith.constant 0 : index
    %11 = vector.load %arg4[%c0_6, %c0_7] : memref<8x1xf32, #tpu.memory_space<vmem>>, vector<8x1xf32>
    tpu.vector_store %arg4[%c0_6, %c0_7], %10 {strides = array<i32>} : memref<8x1xf32, #tpu.memory_space<vmem>>, vector<8x1xf32>,
    return
  }
  func.func @transform_0(%arg0: i32) -> (i32, i32) {
    %c0_i32 = arith.constant 0 : i32
    %c0_i32_0 = arith.constant 0 : i32
    return %arg0, %c0_i32 : i32, i32
  }
  func.func @transform_1(%arg0: i32) -> (i32, i32) {
    %c0_i32 = arith.constant 0 : i32
    %c0_i32_0 = arith.constant 0 : i32
    %c0_i32_1 = arith.constant 0 : i32
    return %c0_i32, %c0_i32_0 : i32, i32
  }
  func.func @transform_2(%arg0: i32) -> (i32, i32) {
    %c0_i32 = arith.constant 0 : i32
    %c0_i32_0 = arith.constant 0 : i32
    %c0_i32_1 = arith.constant 0 : i32
    return %c0_i32, %c0_i32_0 : i32, i32
  }
  func.func @transform_3(%arg0: i32) -> (i32, i32) {
    %c0_i32 = arith.constant 0 : i32
    %c0_i32_0 = arith.constant 0 : i32
    return %arg0, %c0_i32 : i32, i32
  }
}

</mosaic_0001>

<bundles_post_ra>
// kernel: tpu_custom_call.1
= control target key start
LH: loop header
LB: loop body
LE: loop exit
PB: predicated region body
PF: predicated region fallthrough
CT: control target
= control target key end

     0   :  { %8 = vsyncpa [#allocation3], 0  ;;  %s234_s0 = inlined_call_operand.hbm [shape: f32[8,32], index: 0, kind: input, shape index: {}]   ;;  %s235_s1 = inlined_call_operand.hbm [shape: f32[32,256], index: 1, kind: input, shape index: {}]   ;;  %s236_s2 = inlined_call_operand.vmem [shape: f32[1,256], index: 2, kind: input, shape index: {}]   ;;  %s237_s3 = inlined_call_operand.vmem [shape: f32[8,1], index: 3, kind: output, shape index: {}]  }
   0x1   :  { %9 = vsyncpa [#allocation5], 0  ;;  %s197_s12 = smov [#allocation2]   ;;  %s198_s14 = smov [#allocation4]  }
   0x2   :  { %s16_s13 = sshll.u32 %s197_s12, 4  ;;  %s25_s15 = sshll.u32 %s198_s14, 4  ;;  %s17_s13 = int_to_ptr.vmem [resolvable:$true] %s16_s13  ;;  %s26_s15 = int_to_ptr.vmem [resolvable:$true] %s25_s15 }
   0x3   :  { %s161_s16 = scalar_lea.vmem %s17_s13, 128  ;;  %p166_p1 = scmp.lt.s32.totalorder %s17_s13, %s17_s13 }
   0x4   :  { %p162_p0 = scmp.ne.s32.totalorder %s17_s13, %s161_s16  ;;  %p167_p2 = scmp.lt.s32.totalorder %s161_s16, %s161_s16 }
   0x6   :  { %p168_p3 = por %p167_p2, %p166_p1 }
   0x8   :  { %p169_p4 = pnand %p168_p3, %p162_p0 }
   0xa   :  { %172 = shalt.err (!%p169_p4)
}
   0xb   :  { %19 = dma.hbm_to_vmem [thread:$0]  %s234_s0, 128, %s17_s13, [#allocation3]  }
   0xc   :  { %s181_s19 = scalar_lea.vmem %s26_s15, 1024  ;;  %p186_p6 = scmp.lt.s32.totalorder %s26_s15, %s26_s15 }
   0xd   :  { %p182_p5 = scmp.ne.s32.totalorder %s26_s15, %s181_s19  ;;  %p187_p7 = scmp.lt.s32.totalorder %s181_s19, %s181_s19 }
   0xf   :  { %p188_p8 = por %p187_p7, %p186_p6 }
  0x11   :  { %p189_p9 = pnand %p188_p8, %p182_p5 }
  0x13   :  { %192 = shalt.err (!%p189_p9)
}
  0x14   :  { %s199_s20 = smov 256   ;;  %s200_s21 = smov 16  }
  0x15   :  { %31 = dma.hbm_to_vmem [thread:$0]  %s235_s1, 1024, %s26_s15, [#allocation5], %s199_s20, %s199_s20, %s200_s21  }
  0x16   :  { %193 = dma.done.wait [#allocation3], 128  }
  0x17   :  { %194 = vsyncadd [#allocation3], 4294967168 }
  0x18   :  { %195 = dma.done.wait [#allocation5], 1024  }
  0x19   :  { %196 = vsyncadd [#allocation5], 4294966272  ;;  %v201_v0 = vmov 0.0   ;;  %v48_v1 = vld [vmem:[#allocation4 + $0x38] sm:$0xff]  ;;  %v47_v2 = vld [vmem:[#allocation4 + $0x30] sm:$0xff]  ;;  %vm61_vm0 = vcmask 261120   ;;  %v51_v10 = vlaneseq }
  0x1a   :  { %129 = vmatprep.mubr.f32.mxu0 %v201_v0  ;;  %v46_v3 = vld [vmem:[#allocation4 + $0x28] sm:$0xff]  ;;  %89 = vmatprep.subr.mxu0 %v48_v1  ;;  %v45_v4 = vld [vmem:[#allocation4 + $0x20] sm:$0xff]  ;;  %v44_v5 = vld [vmem:[#allocation4 + $0x18] sm:$0xff]  ;;  %vm139_vm1 = vcmask 7168  }
  0x1b   :  { %90 = vmatpush1.msra.mxu0 %v47_v2  ;;  %v43_v6 = vld [vmem:[#allocation4 + $0x10] sm:$0xff]  ;;  %v42_v7 = vld [vmem:[#allocation4 + $0x8] sm:$0xff]  ;;  %v41_v8 = vld [vmem:[#allocation4] sm:$0xff]  ;;  %v52_v11 = vshrl.u32 %v51_v10, 7 }
  0x1c   :  { %91 = vmatprep.subr.mxu0 %v46_v3  ;;  %v40_v9 = vld [vmem:[#allocation2] sm:$0xff] }
  0x1d   :  { %92 = vmatpush1.msra.mxu0 %v45_v4  ;;  %v53_v12 = vsub.s32 0, %v52_v11  ;;  %v57_v13 = vsub.s32 1, %v52_v11  ;;  %v49_v14 = vld [vmem:[%s236_s2] sm:$0x3] }
  0x1e   :  { %93 = vmatprep.subr.mxu0 %v44_v5 }
  0x1f   :  { %94 = vmatpush1.msra.mxu0 %v43_v6  ;;  %v54_v15 = vrot.slane %v49_v14, %v53_v12  ;;  %v58_v16 = vrot.slane %v49_v14, %v57_v13 }
  0x20   :  { %95 = vmatprep.subr.mxu0 %v42_v7 }
  0x21   :  { %96 = vmatpush1.msra.mxu0 %v41_v8 }
  0x22   :  { %147 = vmatmul.mubr.msk.f32.vlgmr.msra.gmra.mxu0 %vm61_vm0, %v40_v9 }
  0xe2   :  { %v131_v17 = vpop.f32.mrf.mxu0 }
  0xe3   :  { %v132_v19 = vadd.f32 %v131_v17, %v54_v15 }
  0xe4   :  { %v133_v18 = vpop.f32.mrf.mxu0 }
  0xe5   :  { %v134_v20 = vadd.f32 %v133_v18, %v58_v16 }
  0xe7   :  { %v136_v21 = vmul.f32 %v134_v20, %v132_v19 }
  0xe9   :  { %137 = vadd.xlane.f32.xlu0 %v136_v21 }
 0x172   :  { %v138_v22 = vpop.xlane.xlu0 %137 }
 0x173   :  { %140 = vst.msk [vmem:[%s237_s3] sm:$0xff] %vm139_vm1, %v138_v22 }
 0x174   :  { %145 = vsyncpa [#allocation3], 1 }
 0x175   :  { %146 = vsyncpa [#allocation5], 1 }

</bundles_post_ra>
